<compile_context>
chip_gen: v6e
topology: v6e:2x2x1
jax: 0.10.0
libtpu: 0.0.40
codegen_flags: <defaults>
</compile_context>

<pallas_src>
import math

import jax
import jax.numpy as jnp
from jax.experimental import pallas as pl
from jax.experimental.pallas import tpu as pltpu


def _mha_kernel(num_heads, head_dim, b_block, seq_len, embed_dim):
    T, E, D, H = seq_len, embed_dim, head_dim, num_heads

    def kernel(x_ref, beff_ref, wqkv_ref, wo_ref, bo_ref, out_ref):
        # x_ref:    (b_block, T, E)   f32
        # beff_ref: (b_block, 3E)     f32  (QKV bias with residual + scale folded)
        # wqkv_ref: (E, 3E)           bf16 (head-grouped [q_h|k_h|v_h], scale folded)
        # wo_ref:   (E, E)            bf16 (out-proj weight, pre-transposed)
        # bo_ref:   (1, E)            f32
        x = x_ref[...]
        xf = x.reshape(b_block * T, E).astype(jnp.bfloat16)

        # Single fused QKV projection on the MXU (bf16 in, f32 accumulate).
        qkv = jnp.dot(xf, wqkv_ref[...], preferred_element_type=jnp.float32)
        qkv = qkv.reshape(b_block, T, 3 * E) + beff_ref[...][:, None, :]

        wo_t = wo_ref[...]                                  # (E, E) bf16
        acc = jnp.zeros((b_block * T, E), jnp.float32)

        # Static head loop: H is tiny (4) so Python unrolling keeps lane
        # slices static; dynamic-index slicing under fori_loop would be
        # worse here.
        # TODO(synk): move heads onto the grid (or lax.fori_loop) if H grows.
        for h in range(H):
            lo = h * 3 * D
            chunk = qkv[:, :, lo:lo + 3 * D]                # contiguous per-head chunk
            qh = chunk[:, :, 0 * D:1 * D].astype(jnp.bfloat16)   # (b, T, D)
            kh = chunk[:, :, 1 * D:2 * D].astype(jnp.bfloat16)
            vh = chunk[:, :, 2 * D:3 * D].astype(jnp.bfloat16)

            # Scores: batched q @ k^T (the 1/sqrt(D) scale is already in wq/bq).
            s = jnp.einsum('bqd,bkd->bqk', qh, kh,
                           preferred_element_type=jnp.float32)
            s = s - jnp.max(s, axis=-1, keepdims=True)
            p = jnp.exp(s)
            p = p * pl.reciprocal(jnp.sum(p, axis=-1, keepdims=True),
                                  approx=True)

            ctx = jnp.einsum('bqk,bkd->bqd', p.astype(jnp.bfloat16), vh,
                             preferred_element_type=jnp.float32)  # (b, T, D)

            # Fold the head concat into the output projection:
            #   out += ctx_h @ wo^T[hD:(h+1)D, :]
            acc = acc + jnp.dot(
                ctx.reshape(b_block * T, D).astype(jnp.bfloat16),
                wo_t[h * D:(h + 1) * D, :],
                preferred_element_type=jnp.float32)

        # Bias added once; single full-block store.
        out_ref[...] = (acc + bo_ref[...]).reshape(b_block, T, E)

    return kernel


def _tensorcores_per_chip():
    # Best-effort sniff; a wrong answer only affects blocking, never
    # correctness. v7x has 2 TensorCores per chip, v5e/v6e have 1.
    try:
        kind = jax.devices()[0].device_kind.lower()
    except Exception:
        return 1
    return 2 if ("v7" in kind or "7x" in kind) else 1


def _pick_b_block(B, T, E, multi_tc):
    """Largest divisor of B whose double-buffered block footprint stays tiny
    relative to every generation's scoped-VMEM default (16 MiB on v5e)."""
    per_b = 4 * (2 * T * E + 3 * E + 4 * T * 3 * E)   # x+out blocks, bias, temps
    cap = max(1, (4 << 20) // (2 * per_b))
    if multi_tc and B >= 2:
        cap = min(cap, B // 2)    # keep >=2 grid steps so both TCs get work
    bb = 1
    for d in range(1, B + 1):
        if B % d == 0 and d <= cap:
            bb = d
    return bb


def causal_mha_pallas(x, residual, params, num_heads):
    """x: (B, T, E) f32, residual: (B, E) f32. Returns (B, T, E) f32."""
    B, T, E = x.shape
    H = num_heads
    D = E // H
    wq, wk, wv, bq, bk, bv, wo, bo = params

    scale = 1.0 / math.sqrt(D)

    # ---- host-side folding (exact, done once per call in XLA) -------------
    # 1) fold the 1/sqrt(D) scale into the Q projection.
    wq_s = wq * scale
    bq_s = bq * scale

    # 2) pre-transpose + regroup the fused QKV weight so each head's
    #    [q_h | k_h | v_h] columns are contiguous: (E, H*3D) == (E, 3E).
    def regroup_w(wq_t, wk_t, wv_t):
        stk = jnp.stack([wq_t.reshape(E, H, D),
                         wk_t.reshape(E, H, D),
                         wv_t.reshape(E, H, D)], axis=2)    # (E, H, 3, D)
        return stk.reshape(E, 3 * E)

    w_qkv = regroup_w(wq_s.T, wk.T, wv.T)                   # (E, 3E) f32
    b_qkv = jnp.stack([bq_s.reshape(1, H, D),
                       bk.reshape(1, H, D),
                       bv.reshape(1, H, D)], axis=2).reshape(1, 3 * E)

    # 3) fold the residual subtraction into a per-batch QKV bias:
    #    (x - r) @ W + b  ==  x @ W + (b - r @ W).
    b_eff = b_qkv - residual @ w_qkv                        # (B, 3E) f32

    # 4) bf16 weights for the MXU; activations cast at the dot inputs only.
    w_qkv_bf16 = w_qkv.astype(jnp.bfloat16)
    wo_t_bf16 = wo.T.astype(jnp.bfloat16)                   # (E, E)

    b_block = _pick_b_block(B, T, E, _tensorcores_per_chip() >= 2)
    grid = (B // b_block,)

    flops = B * (2 * T * E * 3 * E          # fused QKV projection
                 + 4 * T * T * E            # scores + p@v over all heads
                 + 2 * T * E * E)           # output projection (folded per head)
    transcendentals = B * H * T * (T + 1)   # exp + reciprocal
    bytes_accessed = (4 * (x.size + b_eff.size + bo.size + B * T * E)
                      + 2 * (w_qkv_bf16.size + wo_t_bf16.size))

    full = lambda shape: pl.BlockSpec(shape, lambda b: tuple(0 for _ in shape))

    return pl.pallas_call(
        _mha_kernel(H, D, b_block, T, E),
        out_shape=jax.ShapeDtypeStruct((B, T, E), jnp.float32),
        grid_spec=pl.GridSpec(
            grid=grid,
            in_specs=[
                pl.BlockSpec((b_block, T, E), lambda b: (b, 0, 0)),   # x
                pl.BlockSpec((b_block, 3 * E), lambda b: (b, 0)),     # b_eff
                full((E, 3 * E)),                                     # w_qkv (bf16)
                full((E, E)),                                         # wo^T  (bf16)
                full((1, E)),                                         # bo
            ],
            out_specs=pl.BlockSpec((b_block, T, E), lambda b: (b, 0, 0)),
        ),
        compiler_params=pltpu.CompilerParams(
            dimension_semantics=("parallel",),
            vmem_limit_bytes=32 * 1024 * 1024),
        cost_estimate=pl.CostEstimate(
            flops=flops,
            transcendentals=transcendentals,
            bytes_accessed=bytes_accessed),
    )(x, b_eff, w_qkv_bf16, wo_t_bf16, bo)


def causal_mha_reference(x, residual, params, num_heads):
    """Pure-JAX f32 reference mirroring the PyTorch nn.MultiheadAttention forward."""
    B, T, E = x.shape
    D = E // num_heads
    wq, wk, wv, bq, bk, bv, wo, bo = params
    x_adj = x - residual[:, None, :]
    q = jnp.einsum('bte,fe->btf', x_adj, wq) + bq
    k = jnp.einsum('bte,fe->btf', x_adj, wk) + bk
    v = jnp.einsum('bte,fe->btf', x_adj, wv) + bv
    q = q.reshape(B, T, num_heads, D) / math.sqrt(D)
    k = k.reshape(B, T, num_heads, D)
    v = v.reshape(B, T, num_heads, D)
    s = jnp.einsum('bqhd,bkhd->bhqk', q, k)
    p = jax.nn.softmax(s, axis=-1)
    ctx = jnp.einsum('bhqk,bkhd->bqhd', p, v).reshape(B, T, E)
    return jnp.einsum('bte,fe->btf', ctx, wo) + bo


if __name__ == "__main__":
    # Small shapes consistent with the module: embed_dim=32, num_heads=4,
    # batch=2, seq=8.
    B, T, E, H = 2, 8, 32, 4

    key = jax.random.PRNGKey(0)
    keys = jax.random.split(key, 10)

    # Deterministic synthetic parameters (nn.MultiheadAttention shapes:
    # in_proj_weight (3E, E) split into wq/wk/wv; out_proj (E, E)).
    wq = jax.random.normal(keys[0], (E, E), jnp.float32) * 0.1
    wk = jax.random.normal(keys[1], (E, E), jnp.float32) * 0.1
    wv = jax.random.normal(keys[2], (E, E), jnp.float32) * 0.1
    bq = jax.random.normal(keys[3], (1, E), jnp.float32) * 0.1
    bk = jax.random.normal(keys[4], (1, E), jnp.float32) * 0.1
    bv = jax.random.normal(keys[5], (1, E), jnp.float32) * 0.1
    wo = jax.random.normal(keys[6], (E, E), jnp.float32) * 0.1
    bo = jax.random.normal(keys[7], (1, E), jnp.float32) * 0.1
    params = (wq, wk, wv, bq, bk, bv, wo, bo)

    x = jax.random.normal(keys[8], (B, T, E), jnp.float32)
    residual = jax.random.normal(keys[9], (B, E), jnp.float32)

    out = causal_mha_pallas(x, residual, params, H)
    out = jax.block_until_ready(out)

    ref = causal_mha_reference(x, residual, params, H)
    assert out.shape == (B, T, E)
    # Tolerance accounts for bf16 MXU operands (f32 accumulate) and the EUP
    # approximate reciprocal in the softmax; the reference is full f32.
    assert jnp.allclose(out, ref, atol=2e-2, rtol=2e-2), \
        f"max err {jnp.max(jnp.abs(out - ref))}"

    print("KERNEL_OK")
</pallas_src>

<mosaic_0001>
module attributes {stable_mosaic.version = 11 : i64} {
  func.func @kernel(%arg0: i32, %arg1: memref<2x8x32xf32, #tpu.memory_space<vmem>>, %arg2: memref<2x96xf32, #tpu.memory_space<vmem>>, %arg3: memref<32x96xbf16, #tpu.memory_space<vmem>>, %arg4: memref<32x32xbf16, #tpu.memory_space<vmem>>, %arg5: memref<1x32xf32, #tpu.memory_space<vmem>>, %arg6: memref<2x8x32xf32, #tpu.memory_space<vmem>>) attributes {dimension_semantics = [#tpu.dimension_semantics<parallel>], iteration_bounds = array<i64: 1>, scalar_prefetch = 0 : i64, scratch_operands = 0 : i64, tpu.core_type = #tpu.core_type<tc>, window_params = [{transform_indices = @transform_0, window_bounds = array<i64: 2, 8, 32>}, {transform_indices = @transform_1, window_bounds = array<i64: 2, 96>}, {pipeline_mode = #tpu.pipeline_mode<synchronous>, transform_indices = @transform_2, window_bounds = array<i64: 32, 96>}, {pipeline_mode = #tpu.pipeline_mode<synchronous>, transform_indices = @transform_3, window_bounds = array<i64: 32, 32>}, {pipeline_mode = #tpu.pipeline_mode<synchronous>, transform_indices = @transform_4, window_bounds = array<i64: 1, 32>}, {transform_indices = @transform_5, window_bounds = array<i64: 2, 8, 32>}]} {
    %c0 = arith.constant 0 : index
    %c0_0 = arith.constant 0 : index
    %c0_1 = arith.constant 0 : index
    %0 = vector.load %arg1[%c0, %c0_0, %c0_1] : memref<2x8x32xf32, #tpu.memory_space<vmem>>, vector<2x8x32xf32>
    %1 = vector.shape_cast %0 : vector<2x8x32xf32> to vector<16x32xf32>
    %2 = arith.truncf %1 : vector<16x32xf32> to vector<16x32xbf16>
    %c0_2 = arith.constant 0 : index
    %c0_3 = arith.constant 0 : index
    %3 = vector.load %arg3[%c0_2, %c0_3] : memref<32x96xbf16, #tpu.memory_space<vmem>>, vector<32x96xbf16>
    %cst = arith.constant dense<0.000000e+00> : vector<16x96xf32>
    %4 = tpu.matmul %2, %3, %cst {dimension_numbers = #tpu.dot_dimension_numbers<[1], [0], [0], [1], [0, 0, 1, 1], [], []>} : vector<16x32xbf16>, vector<32x96xbf16>, vector<16x96xf32> -> vector<16x96xf32>
    %5 = vector.shape_cast %4 : vector<16x96xf32> to vector<2x8x96xf32>
    %c0_4 = arith.constant 0 : index
    %c0_5 = arith.constant 0 : index
    %6 = vector.load %arg2[%c0_4, %c0_5] : memref<2x96xf32, #tpu.memory_space<vmem>>, vector<2x96xf32>
    %7 = vector.shape_cast %6 : vector<2x96xf32> to vector<2x1x96xf32>
    %8 = vector.broadcast %7 : vector<2x1x96xf32> to vector<2x8x96xf32>
    %9 = arith.addf %5, %8 : vector<2x8x96xf32>
    %c0_6 = arith.constant 0 : index
    %c0_7 = arith.constant 0 : index
    %10 = vector.load %arg4[%c0_6, %c0_7] : memref<32x32xbf16, #tpu.memory_space<vmem>>, vector<32x32xbf16>
    %cst_8 = arith.constant 0.000000e+00 : f32
    %11 = vector.broadcast %cst_8 : f32 to vector<16x32xf32>
    %12 = vector.extract_strided_slice %9 {offsets = [0, 0, 0], sizes = [2, 8, 24], strides = [1, 1, 1]} : vector<2x8x96xf32> to vector<2x8x24xf32>
    %13 = vector.extract_strided_slice %12 {offsets = [0, 0, 0], sizes = [2, 8, 8], strides = [1, 1, 1]} : vector<2x8x24xf32> to vector<2x8x8xf32>
    %14 = arith.truncf %13 : vector<2x8x8xf32> to vector<2x8x8xbf16>
    %15 = vector.extract_strided_slice %12 {offsets = [0, 0, 8], sizes = [2, 8, 8], strides = [1, 1, 1]} : vector<2x8x24xf32> to vector<2x8x8xf32>
    %16 = arith.truncf %15 : vector<2x8x8xf32> to vector<2x8x8xbf16>
    %17 = vector.extract_strided_slice %12 {offsets = [0, 0, 16], sizes = [2, 8, 8], strides = [1, 1, 1]} : vector<2x8x24xf32> to vector<2x8x8xf32>
    %18 = arith.truncf %17 : vector<2x8x8xf32> to vector<2x8x8xbf16>
    "tpu.trace_start"() <{level = 10 : i32, message = "bqd,bkd->bqk"}> : () -> ()
    %cst_9 = arith.constant dense<0.000000e+00> : vector<2x8x8xf32>
    %19 = tpu.matmul %14, %16, %cst_9 {dimension_numbers = #tpu.dot_dimension_numbers<[2], [2], [1], [1], [0, 0, 0, 1, 1, 1], [0], [0]>} : vector<2x8x8xbf16>, vector<2x8x8xbf16>, vector<2x8x8xf32> -> vector<2x8x8xf32>
    "tpu.trace_stop"() : () -> ()
    %cst_10 = arith.constant dense<0xFF800000> : vector<2x8xf32>
    %20 = vector.multi_reduction <maximumf>, %19, %cst_10 [2] : vector<2x8x8xf32> to vector<2x8xf32>
    %21 = vector.shape_cast %20 : vector<2x8xf32> to vector<2x8x1xf32>
    %22 = vector.broadcast %21 : vector<2x8x1xf32> to vector<2x8x8xf32>
    %23 = arith.subf %19, %22 : vector<2x8x8xf32>
    %24 = math.exp %23 : vector<2x8x8xf32>
    %cst_11 = arith.constant dense<0.000000e+00> : vector<2x8xf32>
    %25 = vector.multi_reduction <add>, %24, %cst_11 [2] : vector<2x8x8xf32> to vector<2x8xf32>
    %26 = vector.shape_cast %25 : vector<2x8xf32> to vector<2x8x1xf32>
    %27 = tpu.reciprocal %26 {approx = true} : vector<2x8x1xf32> -> vector<2x8x1xf32>
    %28 = vector.broadcast %27 : vector<2x8x1xf32> to vector<2x8x8xf32>
    %29 = arith.mulf %24, %28 : vector<2x8x8xf32>
    %30 = arith.truncf %29 : vector<2x8x8xf32> to vector<2x8x8xbf16>
    "tpu.trace_start"() <{level = 10 : i32, message = "bqk,bkd->bqd"}> : () -> ()
    %cst_12 = arith.constant dense<0.000000e+00> : vector<2x8x8xf32>
    %31 = tpu.matmul %30, %18, %cst_12 {dimension_numbers = #tpu.dot_dimension_numbers<[2], [1], [1], [2], [0, 0, 0, 1, 1, 2], [0], [0]>} : vector<2x8x8xbf16>, vector<2x8x8xbf16>, vector<2x8x8xf32> -> vector<2x8x8xf32>
    "tpu.trace_stop"() : () -> ()
    %32 = vector.shape_cast %31 : vector<2x8x8xf32> to vector<16x8xf32>
    %33 = arith.truncf %32 : vector<16x8xf32> to vector<16x8xbf16>
    %34 = vector.extract_strided_slice %10 {offsets = [0, 0], sizes = [8, 32], strides = [1, 1]} : vector<32x32xbf16> to vector<8x32xbf16>
    %cst_13 = arith.constant dense<0.000000e+00> : vector<16x32xf32>
    %35 = tpu.matmul %33, %34, %cst_13 {dimension_numbers = #tpu.dot_dimension_numbers<[1], [0], [0], [1], [0, 0, 1, 1], [], []>} : vector<16x8xbf16>, vector<8x32xbf16>, vector<16x32xf32> -> vector<16x32xf32>
    %36 = arith.addf %11, %35 : vector<16x32xf32>
    %37 = vector.extract_strided_slice %9 {offsets = [0, 0, 24], sizes = [2, 8, 24], strides = [1, 1, 1]} : vector<2x8x96xf32> to vector<2x8x24xf32>
    %38 = vector.extract_strided_slice %37 {offsets = [0, 0, 0], sizes = [2, 8, 8], strides = [1, 1, 1]} : vector<2x8x24xf32> to vector<2x8x8xf32>
    %39 = arith.truncf %38 : vector<2x8x8xf32> to vector<2x8x8xbf16>
    %40 = vector.extract_strided_slice %37 {offsets = [0, 0, 8], sizes = [2, 8, 8], strides = [1, 1, 1]} : vector<2x8x24xf32> to vector<2x8x8xf32>
    %41 = arith.truncf %40 : vector<2x8x8xf32> to vector<2x8x8xbf16>
    %42 = vector.extract_strided_slice %37 {offsets = [0, 0, 16], sizes = [2, 8, 8], strides = [1, 1, 1]} : vector<2x8x24xf32> to vector<2x8x8xf32>
    %43 = arith.truncf %42 : vector<2x8x8xf32> to vector<2x8x8xbf16>
    "tpu.trace_start"() <{level = 10 : i32, message = "bqd,bkd->bqk"}> : () -> ()
    %cst_14 = arith.constant dense<0.000000e+00> : vector<2x8x8xf32>
    %44 = tpu.matmul %39, %41, %cst_14 {dimension_numbers = #tpu.dot_dimension_numbers<[2], [2], [1], [1], [0, 0, 0, 1, 1, 1], [0], [0]>} : vector<2x8x8xbf16>, vector<2x8x8xbf16>, vector<2x8x8xf32> -> vector<2x8x8xf32>
    "tpu.trace_stop"() : () -> ()
    %cst_15 = arith.constant dense<0xFF800000> : vector<2x8xf32>
    %45 = vector.multi_reduction <maximumf>, %44, %cst_15 [2] : vector<2x8x8xf32> to vector<2x8xf32>
    %46 = vector.shape_cast %45 : vector<2x8xf32> to vector<2x8x1xf32>
    %47 = vector.broadcast %46 : vector<2x8x1xf32> to vector<2x8x8xf32>
    %48 = arith.subf %44, %47 : vector<2x8x8xf32>
    %49 = math.exp %48 : vector<2x8x8xf32>
    %cst_16 = arith.constant dense<0.000000e+00> : vector<2x8xf32>
    %50 = vector.multi_reduction <add>, %49, %cst_16 [2] : vector<2x8x8xf32> to vector<2x8xf32>
    %51 = vector.shape_cast %50 : vector<2x8xf32> to vector<2x8x1xf32>
    %52 = tpu.reciprocal %51 {approx = true} : vector<2x8x1xf32> -> vector<2x8x1xf32>
    %53 = vector.broadcast %52 : vector<2x8x1xf32> to vector<2x8x8xf32>
    %54 = arith.mulf %49, %53 : vector<2x8x8xf32>
    %55 = arith.truncf %54 : vector<2x8x8xf32> to vector<2x8x8xbf16>
    "tpu.trace_start"() <{level = 10 : i32, message = "bqk,bkd->bqd"}> : () -> ()
    %cst_17 = arith.constant dense<0.000000e+00> : vector<2x8x8xf32>
    %56 = tpu.matmul %55, %43, %cst_17 {dimension_numbers = #tpu.dot_dimension_numbers<[2], [1], [1], [2], [0, 0, 0, 1, 1, 2], [0], [0]>} : vector<2x8x8xbf16>, vector<2x8x8xbf16>, vector<2x8x8xf32> -> vector<2x8x8xf32>
    "tpu.trace_stop"() : () -> ()
    %57 = vector.shape_cast %56 : vector<2x8x8xf32> to vector<16x8xf32>
    %58 = arith.truncf %57 : vector<16x8xf32> to vector<16x8xbf16>
    %59 = vector.extract_strided_slice %10 {offsets = [8, 0], sizes = [8, 32], strides = [1, 1]} : vector<32x32xbf16> to vector<8x32xbf16>
    %cst_18 = arith.constant dense<0.000000e+00> : vector<16x32xf32>
    %60 = tpu.matmul %58, %59, %cst_18 {dimension_numbers = #tpu.dot_dimension_numbers<[1], [0], [0], [1], [0, 0, 1, 1], [], []>} : vector<16x8xbf16>, vector<8x32xbf16>, vector<16x32xf32> -> vector<16x32xf32>
    %61 = arith.addf %36, %60 : vector<16x32xf32>
    %62 = vector.extract_strided_slice %9 {offsets = [0, 0, 48], sizes = [2, 8, 24], strides = [1, 1, 1]} : vector<2x8x96xf32> to vector<2x8x24xf32>
    %63 = vector.extract_strided_slice %62 {offsets = [0, 0, 0], sizes = [2, 8, 8], strides = [1, 1, 1]} : vector<2x8x24xf32> to vector<2x8x8xf32>
    %64 = arith.truncf %63 : vector<2x8x8xf32> to vector<2x8x8xbf16>
    %65 = vector.extract_strided_slice %62 {offsets = [0, 0, 8], sizes = [2, 8, 8], strides = [1, 1, 1]} : vector<2x8x24xf32> to vector<2x8x8xf32>
    %66 = arith.truncf %65 : vector<2x8x8xf32> to vector<2x8x8xbf16>
    %67 = vector.extract_strided_slice %62 {offsets = [0, 0, 16], sizes = [2, 8, 8], strides = [1, 1, 1]} : vector<2x8x24xf32> to vector<2x8x8xf32>
    %68 = arith.truncf %67 : vector<2x8x8xf32> to vector<2x8x8xbf16>
    "tpu.trace_start"() <{level = 10 : i32, message = "bqd,bkd->bqk"}> : () -> ()
    %cst_19 = arith.constant dense<0.000000e+00> : vector<2x8x8xf32>
    %69 = tpu.matmul %64, %66, %cst_19 {dimension_numbers = #tpu.dot_dimension_numbers<[2], [2], [1], [1], [0, 0, 0, 1, 1, 1], [0], [0]>} : vector<2x8x8xbf16>, vector<2x8x8xbf16>, vector<2x8x8xf32> -> vector<2x8x8xf32>
    "tpu.trace_stop"() : () -> ()
    %cst_20 = arith.constant dense<0xFF800000> : vector<2x8xf32>
    %70 = vector.multi_reduction <maximumf>, %69, %cst_20 [2] : vector<2x8x8xf32> to vector<2x8xf32>
    %71 = vector.shape_cast %70 : vector<2x8xf32> to vector<2x8x1xf32>
    %72 = vector.broadcast %71 : vector<2x8x1xf32> to vector<2x8x8xf32>
    %73 = arith.subf %69, %72 : vector<2x8x8xf32>
    %74 = math.exp %73 : vector<2x8x8xf32>
    %cst_21 = arith.constant dense<0.000000e+00> : vector<2x8xf32>
    %75 = vector.multi_reduction <add>, %74, %cst_21 [2] : vector<2x8x8xf32> to vector<2x8xf32>
    %76 = vector.shape_cast %75 : vector<2x8xf32> to vector<2x8x1xf32>
    %77 = tpu.reciprocal %76 {approx = true} : vector<2x8x1xf32> -> vector<2x8x1xf32>
    %78 = vector.broadcast %77 : vector<2x8x1xf32> to vector<2x8x8xf32>
    %79 = arith.mulf %74, %78 : vector<2x8x8xf32>
    %80 = arith.truncf %79 : vector<2x8x8xf32> to vector<2x8x8xbf16>
    "tpu.trace_start"() <{level = 10 : i32, message = "bqk,bkd->bqd"}> : () -> ()
    %cst_22 = arith.constant dense<0.000000e+00> : vector<2x8x8xf32>
    %81 = tpu.matmul %80, %68, %cst_22 {dimension_numbers = #tpu.dot_dimension_numbers<[2], [1], [1], [2], [0, 0, 0, 1, 1, 2], [0], [0]>} : vector<2x8x8xbf16>, vector<2x8x8xbf16>, vector<2x8x8xf32> -> vector<2x8x8xf32>
    "tpu.trace_stop"() : () -> ()
    %82 = vector.shape_cast %81 : vector<2x8x8xf32> to vector<16x8xf32>
    %83 = arith.truncf %82 : vector<16x8xf32> to vector<16x8xbf16>
    %84 = vector.extract_strided_slice %10 {offsets = [16, 0], sizes = [8, 32], strides = [1, 1]} : vector<32x32xbf16> to vector<8x32xbf16>
    %cst_23 = arith.constant dense<0.000000e+00> : vector<16x32xf32>
    %85 = tpu.matmul %83, %84, %cst_23 {dimension_numbers = #tpu.dot_dimension_numbers<[1], [0], [0], [1], [0, 0, 1, 1], [], []>} : vector<16x8xbf16>, vector<8x32xbf16>, vector<16x32xf32> -> vector<16x32xf32>
    %86 = arith.addf %61, %85 : vector<16x32xf32>
    %87 = vector.extract_strided_slice %9 {offsets = [0, 0, 72], sizes = [2, 8, 24], strides = [1, 1, 1]} : vector<2x8x96xf32> to vector<2x8x24xf32>
    %88 = vector.extract_strided_slice %87 {offsets = [0, 0, 0], sizes = [2, 8, 8], strides = [1, 1, 1]} : vector<2x8x24xf32> to vector<2x8x8xf32>
    %89 = arith.truncf %88 : vector<2x8x8xf32> to vector<2x8x8xbf16>
    %90 = vector.extract_strided_slice %87 {offsets = [0, 0, 8], sizes = [2, 8, 8], strides = [1, 1, 1]} : vector<2x8x24xf32> to vector<2x8x8xf32>
    %91 = arith.truncf %90 : vector<2x8x8xf32> to vector<2x8x8xbf16>
    %92 = vector.extract_strided_slice %87 {offsets = [0, 0, 16], sizes = [2, 8, 8], strides = [1, 1, 1]} : vector<2x8x24xf32> to vector<2x8x8xf32>
    %93 = arith.truncf %92 : vector<2x8x8xf32> to vector<2x8x8xbf16>
    "tpu.trace_start"() <{level = 10 : i32, message = "bqd,bkd->bqk"}> : () -> ()
    %cst_24 = arith.constant dense<0.000000e+00> : vector<2x8x8xf32>
    %94 = tpu.matmul %89, %91, %cst_24 {dimension_numbers = #tpu.dot_dimension_numbers<[2], [2], [1], [1], [0, 0, 0, 1, 1, 1], [0], [0]>} : vector<2x8x8xbf16>, vector<2x8x8xbf16>, vector<2x8x8xf32> -> vector<2x8x8xf32>
    "tpu.trace_stop"() : () -> ()
    %cst_25 = arith.constant dense<0xFF800000> : vector<2x8xf32>
    %95 = vector.multi_reduction <maximumf>, %94, %cst_25 [2] : vector<2x8x8xf32> to vector<2x8xf32>
    %96 = vector.shape_cast %95 : vector<2x8xf32> to vector<2x8x1xf32>
    %97 = vector.broadcast %96 : vector<2x8x1xf32> to vector<2x8x8xf32>
    %98 = arith.subf %94, %97 : vector<2x8x8xf32>
    %99 = math.exp %98 : vector<2x8x8xf32>
    %cst_26 = arith.constant dense<0.000000e+00> : vector<2x8xf32>
    %100 = vector.multi_reduction <add>, %99, %cst_26 [2] : vector<2x8x8xf32> to vector<2x8xf32>
    %101 = vector.shape_cast %100 : vector<2x8xf32> to vector<2x8x1xf32>
    %102 = tpu.reciprocal %101 {approx = true} : vector<2x8x1xf32> -> vector<2x8x1xf32>
    %103 = vector.broadcast %102 : vector<2x8x1xf32> to vector<2x8x8xf32>
    %104 = arith.mulf %99, %103 : vector<2x8x8xf32>
    %105 = arith.truncf %104 : vector<2x8x8xf32> to vector<2x8x8xbf16>
    "tpu.trace_start"() <{level = 10 : i32, message = "bqk,bkd->bqd"}> : () -> ()
    %cst_27 = arith.constant dense<0.000000e+00> : vector<2x8x8xf32>
    %106 = tpu.matmul %105, %93, %cst_27 {dimension_numbers = #tpu.dot_dimension_numbers<[2], [1], [1], [2], [0, 0, 0, 1, 1, 2], [0], [0]>} : vector<2x8x8xbf16>, vector<2x8x8xbf16>, vector<2x8x8xf32> -> vector<2x8x8xf32>
    "tpu.trace_stop"() : () -> ()
    %107 = vector.shape_cast %106 : vector<2x8x8xf32> to vector<16x8xf32>
    %108 = arith.truncf %107 : vector<16x8xf32> to vector<16x8xbf16>
    %109 = vector.extract_strided_slice %10 {offsets = [24, 0], sizes = [8, 32], strides = [1, 1]} : vector<32x32xbf16> to vector<8x32xbf16>
    %cst_28 = arith.constant dense<0.000000e+00> : vector<16x32xf32>
    %110 = tpu.matmul %108, %109, %cst_28 {dimension_numbers = #tpu.dot_dimension_numbers<[1], [0], [0], [1], [0, 0, 1, 1], [], []>} : vector<16x8xbf16>, vector<8x32xbf16>, vector<16x32xf32> -> vector<16x32xf32>
    %111 = arith.addf %86, %110 : vector<16x32xf32>
    %c0_29 = arith.constant 0 : index
    %c0_30 = arith.constant 0 : index
    %112 = vector.load %arg5[%c0_29, %c0_30] : memref<1x32xf32, #tpu.memory_space<vmem>>, vector<1x32xf32>
    %113 = vector.broadcast %112 : vector<1x32xf32> to vector<16x32xf32>
    %114 = arith.addf %111, %113 : vector<16x32xf32>
    %115 = vector.shape_cast %114 : vector<16x32xf32> to vector<2x8x32xf32>
    %c0_31 = arith.constant 0 : index
    %c0_32 = arith.constant 0 : index
    %c0_33 = arith.constant 0 : index
    %116 = vector.load %arg6[%c0_31, %c0_32, %c0_33] : memref<2x8x32xf32, #tpu.memory_space<vmem>>, vector<2x8x32xf32>
    tpu.vector_store %arg6[%c0_31, %c0_32, %c0_33], %115 {strides = array<i32>} : memref<2x8x32xf32, #tpu.memory_space<vmem>>, vector<2x8x32xf32>,
    return
  }
  func.func @transform_0(%arg0: i32) -> (i32, i32, i32) {
    %c0_i32 = arith.constant 0 : i32
    %c0_i32_0 = arith.constant 0 : i32
    %c0_i32_1 = arith.constant 0 : i32
    return %arg0, %c0_i32, %c0_i32_0 : i32, i32, i32
  }
  func.func @transform_1(%arg0: i32) -> (i32, i32) {
    %c0_i32 = arith.constant 0 : i32
    %c0_i32_0 = arith.constant 0 : i32
    return %arg0, %c0_i32 : i32, i32
  }
  func.func @transform_2(%arg0: i32) -> (i32, i32) {
    %c0_i32 = arith.constant 0 : i32
    %c0_i32_0 = arith.constant 0 : i32
    %c0_i32_1 = arith.constant 0 : i32
    return %c0_i32, %c0_i32_0 : i32, i32
  }
  func.func @transform_3(%arg0: i32) -> (i32, i32) {
    %c0_i32 = arith.constant 0 : i32
    %c0_i32_0 = arith.constant 0 : i32
    %c0_i32_1 = arith.constant 0 : i32
    return %c0_i32, %c0_i32_0 : i32, i32
  }
  func.func @transform_4(%arg0: i32) -> (i32, i32) {
    %c0_i32 = arith.constant 0 : i32
    %c0_i32_0 = arith.constant 0 : i32
    %c0_i32_1 = arith.constant 0 : i32
    return %c0_i32, %c0_i32_0 : i32, i32
  }
  func.func @transform_5(%arg0: i32) -> (i32, i32, i32) {
    %c0_i32 = arith.constant 0 : i32
    %c0_i32_0 = arith.constant 0 : i32
    %c0_i32_1 = arith.constant 0 : i32
    return %arg0, %c0_i32, %c0_i32_0 : i32, i32, i32
  }
}

</mosaic_0001>

<bundles_post_ra>
// kernel: tpu_custom_call.1
= control target key start
LH: loop header
LB: loop body
LE: loop exit
PB: predicated region body
PF: predicated region fallthrough
CT: control target
= control target key end

     0   :  { %10 = vsyncpa [#allocation3], 0  ;;  %s1903_s0 = inlined_call_operand.hbm [shape: f32[2,8,32], index: 0, kind: input, shape index: {}]   ;;  %s1904_s1 = inlined_call_operand.hbm [shape: f32[2,96], index: 1, kind: input, shape index: {}]   ;;  %s1905_s2 = inlined_call_operand.hbm [shape: bf16[32,96], index: 2, kind: input, shape index: {}]   ;;  %s1906_s3 = inlined_call_operand.hbm [shape: bf16[32,32], index: 3, kind: input, shape index: {}]   ;;  %s1907_s4 = inlined_call_operand.vmem [shape: f32[1,32], index: 4, kind: input, shape index: {}]   ;;  %s1908_s5 = inlined_call_operand.hbm [shape: f32[2,8,32], index: 5, kind: output, shape index: {}]  }
   0x1   :  { %11 = vsyncpa [#allocation6], 0 }
   0x2   :  { %12 = vsyncpa [#allocation9], 0 }
   0x3   :  { %13 = vsyncpa [#allocation4], 0  ;;  %s1647_s18 = smov [#allocation5]   ;;  %s1648_s20 = smov [#allocation2]  }
   0x4   :  { %s32_s19 = sshll.u32 %s1647_s18, 4  ;;  %s19_s21 = sshll.u32 %s1648_s20, 4  ;;  %s33_s19 = int_to_ptr.vmem [resolvable:$true] %s32_s19  ;;  %s20_s21 = int_to_ptr.vmem [resolvable:$true] %s19_s21 }
   0x5   :  { %s1547_s22 = scalar_lea.vmem %s33_s19, 32  ;;  %p1552_p1 = scmp.lt.s32.totalorder %s33_s19, %s33_s19 }
   0x6   :  { %p1548_p0 = scmp.ne.s32.totalorder %s33_s19, %s1547_s22  ;;  %p1553_p2 = scmp.lt.s32.totalorder %s1547_s22, %s1547_s22 }
   0x8   :  { %p1554_p3 = por %p1553_p2, %p1552_p1 }
   0xa   :  { %p1555_p4 = pnand %p1554_p3, %p1548_p0 }
   0xc   :  { %1558 = shalt.err (!%p1555_p4)
}
   0xd   :  { %35 = dma.hbm_to_vmem [thread:$0]  %s1904_s1, 32, %s33_s19, [#allocation6]  }
   0xe   :  { %s1567_s25 = scalar_lea.vmem %s20_s21, 256  ;;  %p1572_p6 = scmp.lt.s32.totalorder %s20_s21, %s20_s21 }
   0xf   :  { %p1568_p5 = scmp.ne.s32.totalorder %s20_s21, %s1567_s25  ;;  %p1573_p7 = scmp.lt.s32.totalorder %s1567_s25, %s1567_s25 }
  0x11   :  { %p1574_p8 = por %p1573_p7, %p1572_p6 }
  0x13   :  { %p1575_p9 = pnand %p1574_p8, %p1568_p5 }
  0x15   :  { %1578 = shalt.err (!%p1575_p9)
}
  0x16   :  { %s1649_s26 = smov 128   ;;  %s1650_s27 = smov 8  }
  0x17   :  { %25 = dma.hbm_to_vmem [thread:$0]  %s1903_s0, 256, %s20_s21, [#allocation3], %s1649_s26, %s1649_s26, %s1650_s27  }
  0x18   :  { %s1651_s30 = smov [#allocation7]  }
  0x19   :  { %s41_s6 = sshll.u32 %s1651_s30, 4  ;;  %s42_s6 = int_to_ptr.vmem [resolvable:$true] %s41_s6 }
  0x1a   :  { %s1587_s1 = scalar_lea.vmem %s42_s6, 256  ;;  %p1592_p11 = scmp.lt.s32.totalorder %s42_s6, %s42_s6 }
  0x1b   :  { %p1588_p10 = scmp.ne.s32.totalorder %s42_s6, %s1587_s1  ;;  %p1593_p12 = scmp.lt.s32.totalorder %s1587_s1, %s1587_s1 }
  0x1d   :  { %p1594_p13 = por %p1593_p12, %p1592_p11 }
  0x1f   :  { %p1595_p0 = pnand %p1594_p13, %p1588_p10 }
  0x21   :  { %1598 = shalt.err (!%p1595_p0)
}
  0x22   :  { %s1652_s7 = smov 64   ;;  %s1653_s8 = smov 4  }
  0x23   :  { %47 = dma.hbm_to_vmem [thread:$0]  %s1905_s2, 256, %s42_s6, [#allocation6], %s1652_s7, %s1652_s7, %s1653_s8  }
  0x24   :  { %s1654_s11 = smov [#allocation8]  }
  0x25   :  { %s53_s0 = sshll.u32 %s1654_s11, 4  ;;  %s54_s0 = int_to_ptr.vmem [resolvable:$true] %s53_s0 }
  0x26   :  { %s1607_s12 = scalar_lea.vmem %s54_s0, 256  ;;  %p1612_p2 = scmp.lt.s32.totalorder %s54_s0, %s54_s0 }
  0x27   :  { %p1608_p1 = scmp.ne.s32.totalorder %s54_s0, %s1607_s12  ;;  %p1613_p3 = scmp.lt.s32.totalorder %s1607_s12, %s1607_s12 }
  0x29   :  { %p1614_p4 = por %p1613_p3, %p1612_p2 }
  0x2b   :  { %p1615_p5 = pnand %p1614_p4, %p1608_p1 }
  0x2d   :  { %1618 = shalt.err (!%p1615_p5)
}
  0x2e   :  { %59 = dma.hbm_to_vmem [thread:$0]  %s1906_s3, 256, %s54_s0, [#allocation9], %s1652_s7, %s1652_s7, %s1653_s8  }
  0x2f   :  { %1639 = dma.done.wait [#allocation3], 256  }
  0x30   :  { %1640 = vsyncadd [#allocation3], 4294967040 }
  0x31   :  { %1641 = dma.done.wait [#allocation6], 288  }
  0x32   :  { %1642 = vsyncadd [#allocation6], 4294967008 }
  0x33   :  { %1643 = dma.done.wait [#allocation9], 256  }
  0x34   :  { %1644 = vsyncadd [#allocation9], 4294967040  ;;  %v1655_v0 = vmov 0.0   ;;  %vm1656_vm0 = vmmov 0   ;;  %v1505_v1 = vld [vmem:[#allocation7 + $0x8] sm:$0xff]   ;;  %v1506_v2 = vld [vmem:[#allocation7] sm:$0xff]   ;;  %v152_v8 = vlaneseq }
  0x35   :  { %1355 = vmatprep.subr.bf16.mxu0 %v1655_v0  ;;  %1359 = vmatprep.mubr.msk.bf16.mxu0 %vm1656_vm0, %v1655_v0  ;;  %v75_v3 = vld [vmem:[#allocation2] sm:$0xff]  ;;  %v76_v4 = vld [vmem:[#allocation2 + $0x8] sm:$0xff]  ;;  %vm94_vm1 = vcmask 261120   ;;  %v1657_v6 = vmov 1966171168   ;;  %s1658_s2 = smov 120  }
  0x36   :  { %1363 = vmatprep.subr.bf16.mxu1 %v1655_v0  ;;  %1365 = vmatprep.mubr.msk.bf16.mxu1 %vm1656_vm0, %v1655_v0  ;;  %v77_v5 = vpack.c.bf16 %v76_v4, %v75_v3  ;;  %v150_v7 = vunpack.c.l.s4 %v1657_v6  ;;  %v153_v10 = vshrl.u32 %v152_v8, 7  ;;  %v1290_v12 = vld.sshfl [vmem:[#allocation5] sm:$0x11 pattern:$0x75316420]  ;;  %vm184_vm2 = vcmask 64512  }
  0x37   :  { %1356 = vmatpush3.bf16.msra.mxu0 %v1505_v1  ;;  %v148_v15 = vcombine.high %v1290_v12, %v1290_v12  ;;  %s1659_s3 = smov 112   ;;  %s1660_s15 = smov 96   ;;  %vm309_vm3 = vcmask 1043456  }
  0x38   :  { %1357 = vmatprep.subr.bf16.mxu0 %v1655_v0  ;;  %v151_v9 = vunpack.c.0.s8 %v150_v7  ;;  %v165_v14 = vsub.s32 0, %v153_v10  ;;  %s1661_s16 = smov 104   ;;  %s1662_s17 = smov 88  }
  0x39   :  { %s1663_s18 = smov 80   ;;  %s1664_s19 = smov 72  }
  0x3a   :  { %v154_v11 = vsub.s32 %v151_v9, %v153_v10  ;;  %s1665_s20 = smov 48   ;;  %s1666_s21 = smov 56  }
  0x3b   :  { %1358 = vmatpush3.bf16.msra.mxu0 %v1506_v2  ;;  %s1667_s22 = smov 40   ;;  %s1668_s25 = smov [#allocation10]  }
  0x3c   :  { %1369 = vmatprep.subr.bf16.mxu0 %v1655_v0  ;;  %v155_v13 = vrot.slane %v1290_v12, %v154_v11  ;;  %v162_v17 = vrot.slane %v148_v15, %v154_v11  ;;  %s1273_s28 = sshll.u32 %s1668_s25, 4  ;;  %s1274_s28 = int_to_ptr.vmem [resolvable:$true] %s1273_s28 }
  0x3d   :  { %s1619_s29 = scalar_lea.vmem %s1274_s28, 256  ;;  %p1624_p7 = scmp.lt.s32.totalorder %s1274_s28, %s1274_s28 }
  0x3e   :  { %1360 = vmatmul.mubr.msk.bf16.vlgmr.msra.gmra.mxu0 %vm94_vm1, %v77_v5  ;;  %v166_v16 = vrot.slane %v155_v13, %v165_v14  ;;  %v170_v20 = vrot.slane %v162_v17, %v165_v14  ;;  %p1620_p6 = scmp.ne.s32.totalorder %s1274_s28, %s1619_s29  ;;  %p1625_p8 = scmp.lt.s32.totalorder %s1619_s29, %s1619_s29 }
  0x3f   :  { %1371 = vmatprep.mubr.msk.bf16.mxu0 %vm1656_vm0, %v1655_v0 }
  0x40   :  { %p1626_p9 = por %p1625_p8, %p1624_p7 }
  0x42   :  { %p1627_p10 = pnand %p1626_p9, %p1620_p6 }
  0xfe   :  { %v132_v18 = vpop.f32.mrf.mxu0 }
  0xff   :  { %v173_v19 = vadd.f32 %v166_v16, %v132_v18 }
 0x100   :  { %v1361_v21 = vpop.f32.mrf.mxu0 }
 0x101   :  { %v1729_v22 = vpack.c.bf16 %v173_v19, %v173_v19 }
 0x102   :  { %v135_v23 = vpop.f32.mrf.mxu0 }
 0x103   :  { %v174_v24 = vadd.f32 %v170_v20, %v135_v23  ;;  %182 = vrot.lane.b32.xlu0 %v1729_v22, %s1658_s2 }
 0x104   :  { %v1362_v25 = vpop.f32.mrf.mxu0 }
 0x105   :  { %v1732_v26 = vpack.c.bf16 %v174_v24, %v174_v24 }
 0x107   :  { %232 = vrot.lane.b32.xlu0 %v1732_v26, %s1658_s2 }
 0x175   :  { %v183_v27 = vpop.permute.xlu0 %182 }
 0x176   :  { %v189_v28 = vsel %vm184_vm2, %v183_v27, 0 }
 0x177   :  { %1364 = vmatpush3.bf16.xpose.msra.mxu1 %v189_v28 }
 0x178   :  { %1375 = vmatprep.subr.bf16.mxu1 %v1655_v0 }
 0x179   :  { %v233_v29 = vpop.permute.xlu0 %232 }
 0x17a   :  { %v238_v30 = vsel %vm184_vm2, %v233_v29, 0 }
 0x17b   :  { %1370 = vmatpush3.bf16.xpose.msra.mxu0 %v238_v30 }
 0x17c   :  { %1381 = vmatprep.subr.bf16.mxu0 %v1655_v0 }
 0x17e   :  { %1366 = vmatmul.mubr.msk.bf16.vlgmr.msra.gmra.mxu1 %vm184_vm2, %v1729_v22 }
 0x17f   :  { %1377 = vmatprep.mubr.msk.bf16.mxu1 %vm1656_vm0, %v1655_v0 }
 0x182   :  { %1372 = vmatmul.mubr.msk.bf16.vlgmr.msra.gmra.mxu0 %vm184_vm2, %v1732_v26 }
 0x183   :  { %1383 = vmatprep.mubr.msk.bf16.mxu0 %vm1656_vm0, %v1655_v0 }
 0x23e   :  { %v225_v31 = vpop.f32.mrf.mxu1 }
 0x23f   :  { %v280_v32 = vsel %vm184_vm2, %v225_v31, -inf }
 0x240   :  { %281 = vmax.xlane.f32.xlu1 %v280_v32  ;;  %v1367_v33 = vpop.f32.mrf.mxu1 }
 0x242   :  { %v228_v34 = vpop.f32.mrf.mxu1  ;;  %v274_v35 = vpop.f32.mrf.mxu0 }
 0x243   :  { %v283_v36 = vsel %vm184_vm2, %v274_v35, -inf }
 0x244   :  { %v1368_v37 = vpop.f32.mrf.mxu1  ;;  %284 = vmax.xlane.f32.xlu1 %v283_v36  ;;  %v1373_v38 = vpop.f32.mrf.mxu0 }
 0x246   :  { %v277_v39 = vpop.f32.mrf.mxu0 }
 0x248   :  { %v1374_v40 = vpop.f32.mrf.mxu0 }
 0x255   :  { %304 = vrot.lane.b32.xlu1 %v1729_v22, %s1659_s3 }
 0x259   :  { %353 = vrot.lane.b32.xlu1 %v1732_v26, %s1659_s3 }
 0x25d   :  { %404 = vrot.lane.b32.xlu1 %v1729_v22, %s1660_s15 }
 0x2c9   :  { %v282_v41 = vpop.xlane.xlu1 %281 }
 0x2ca   :  { %v286_v42 = vsub.f32 %v225_v31, %v282_v41 }
 0x2cc   :  { %v288_v43 = vmul.f32 1.442695, %v286_v42 }
 0x2cd   :  { %v285_v44 = vpop.xlane.xlu1 %284 }
 0x2ce   :  { %1507 = vpow2.f32 %v288_v43  ;;  %v287_v45 = vsub.f32 %v274_v35, %v285_v44 }
 0x2d0   :  { %v290_v46 = vmul.f32 1.442695, %v287_v45 }
 0x2d1   :  { %v305_v47 = vpop.permute.xlu1 %304 }
 0x2d2   :  { %1509 = vpow2.f32 %v290_v46  ;;  %v311_v48 = vsel %vm309_vm3, %v305_v47, 0  ;;  %v175_v47 = vld [vmem:[#allocation8] sm:$0xf] }
 0x2d3   :  { %1376 = vmatpush3.bf16.msra.mxu1 %v311_v48 }
 0x2d4   :  { %1387 = vmatprep.subr.bf16.mxu1 %v1655_v0 }
 0x2d5   :  { %v354_v49 = vpop.permute.xlu1 %353 }
 0x2d6   :  { %v359_v50 = vsel %vm309_vm3, %v354_v49, 0 }
 0x2d7   :  { %1382 = vmatpush3.bf16.msra.mxu0 %v359_v50  ;;  %v674_v50 = vsel %vm309_vm3, %v175_v47, 0 }
 0x2d8   :  { %1393 = vmatprep.subr.bf16.mxu0 %v1655_v0 }
 0x2d9   :  { %v405_v55 = vpop.permute.xlu1 %404 }
 0x2da   :  { %v410_v62 = vsel %vm184_vm2, %v405_v55, 0  ;;  %v176_v55 = vld [vmem:[#allocation8 + $0x4] sm:$0xf] }
 0x2db   :  { %v1508_v51 = vpop.eup %1507 }
 0x2dc   :  { %v292_v52 = vsel %vm184_vm2, %v1508_v51, 0.0 }
 0x2dd   :  { %293 = vadd.xlane.f32.xlu0 %v292_v52 }
 0x2df   :  { %v1510_v53 = vpop.eup %1509 }
 0x2e0   :  { %v295_v54 = vsel %vm184_vm2, %v1510_v53, 0.0 }
 0x2e1   :  { %296 = vadd.xlane.f32.xlu1 %v295_v54 }
 0x2f2   :  { %454 = vrot.lane.b32.xlu1 %v1732_v26, %s1660_s15 }
 0x2f3   :  { %402 = vrot.lane.b32.xlu0 %v1729_v22, %s1661_s16 }
 0x2f6   :  { %452 = vrot.lane.b32.xlu1 %v1732_v26, %s1661_s16 }
 0x366   :  { %v294_v56 = vpop.xlane.xlu0 %293 }
 0x367   :  { %1511 = vrcp.f32 %v294_v56  ;;  %v627_v56 = vsel %vm309_vm3, %v176_v55, 0 }
 0x36a   :  { %v297_v57 = vpop.xlane.xlu1 %296  ;;  %v403_v4 = vpop.permute.xlu0 %402 }
 0x36b   :  { %1513 = vrcp.f32 %v297_v57 }
 0x36e   :  { %v455_v1 = vpop.permute.xlu1 %454 }
 0x36f   :  { %v460_v3 = vsel %vm184_vm2, %v455_v1, 0 }
 0x372   :  { %v453_v5 = vpop.permute.xlu1 %452 }
 0x374   :  { %v1512_v58 = vpop.eup %1511 }
 0x375   :  { %v300_v59 = vmul.f32 %v1512_v58, %v1508_v51 }
 0x377   :  { %v302_v60 = vpack.c.bf16 %v300_v59, %v300_v59 }
 0x378   :  { %v1514_v61 = vpop.eup %1513 }
 0x379   :  { %1378 = vmatmul.mubr.msk.bf16.vlgmr.msra.gmra.mxu1 %vm184_vm2, %v302_v60  ;;  %v301_v63 = vmul.f32 %v1514_v61, %v1510_v53 }
 0x37a   :  { %1388 = vmatpush3.bf16.xpose.msra.mxu1 %v410_v62  ;;  %1389 = vmatprep.mubr.msk.bf16.mxu1 %vm1656_vm0, %v1655_v0 }
 0x37b   :  { %v303_v2 = vpack.c.bf16 %v301_v63, %v301_v63  ;;  %1399 = vmatprep.subr.bf16.mxu1 %v1655_v0 }
 0x37d   :  { %1384 = vmatmul.mubr.msk.bf16.vlgmr.msra.gmra.mxu0 %vm184_vm2, %v303_v2 }
 0x37e   :  { %1394 = vmatpush3.bf16.xpose.msra.mxu0 %v460_v3  ;;  %1395 = vmatprep.mubr.msk.bf16.mxu0 %vm1656_vm0, %v1655_v0 }
 0x37f   :  { %1405 = vmatprep.subr.bf16.mxu0 %v1655_v0 }
 0x381   :  { %1390 = vmatmul.mubr.msk.bf16.vlgmr.msra.gmra.mxu1 %vm184_vm2, %v403_v4 }
 0x382   :  { %1401 = vmatprep.mubr.msk.bf16.mxu1 %vm1656_vm0, %v1655_v0 }
 0x385   :  { %1396 = vmatmul.mubr.msk.bf16.vlgmr.msra.gmra.mxu0 %vm184_vm2, %v453_v5 }
 0x386   :  { %1407 = vmatprep.mubr.msk.bf16.mxu0 %vm1656_vm0, %v1655_v0 }
 0x439   :  { %v1777_v6 = vpop.f32.mrf.mxu1 }
 0x43b   :  { %v1379_v7 = vpop.f32.mrf.mxu1 }
 0x43d   :  { %v350_v8 = vpop.f32.mrf.mxu1  ;;  %v1779_v9 = vpop.f32.mrf.mxu0 }
 0x43e   :  { %v401_v10 = vpack.c.bf16 %v1779_v9, %v1777_v6 }
 0x43f   :  { %v1380_v11 = vpop.f32.mrf.mxu1  ;;  %v1385_v12 = vpop.f32.mrf.mxu0 }
 0x441   :  { %v398_v13 = vpop.f32.mrf.mxu0  ;;  %v446_v14 = vpop.f32.mrf.mxu1 }
 0x442   :  { %v502_v15 = vsel %vm184_vm2, %v446_v14, -inf }
 0x443   :  { %503 = vmax.xlane.f32.xlu1 %v502_v15  ;;  %v1386_v16 = vpop.f32.mrf.mxu0  ;;  %v1391_v17 = vpop.f32.mrf.mxu1 }
 0x445   :  { %v449_v18 = vpop.f32.mrf.mxu1  ;;  %v496_v19 = vpop.f32.mrf.mxu0 }
 0x446   :  { %v505_v20 = vsel %vm184_vm2, %v496_v19, -inf }
 0x447   :  { %v1392_v21 = vpop.f32.mrf.mxu1  ;;  %506 = vmax.xlane.f32.xlu0 %v505_v20  ;;  %v1397_v23 = vpop.f32.mrf.mxu0 }
 0x449   :  { %v499_v24 = vpop.f32.mrf.mxu0 }
 0x44b   :  { %v1398_v25 = vpop.f32.mrf.mxu0 }
 0x45d   :  { %574 = vrot.lane.b32.xlu0 %v1732_v26, %s1662_s17 }
 0x461   :  { %717 = vrot.lane.b32.xlu0 %v1729_v22, %s1663_s18 }
 0x4cc   :  { %v504_v27 = vpop.xlane.xlu1 %503 }
 0x4cd   :  { %v508_v28 = vsub.f32 %v446_v14, %v504_v27 }
 0x4cf   :  { %v510_v29 = vmul.f32 1.442695, %v508_v28 }
 0x4d0   :  { %v507_v30 = vpop.xlane.xlu0 %506 }
 0x4d1   :  { %1515 = vpow2.f32 %v510_v29  ;;  %v509_v31 = vsub.f32 %v496_v19, %v507_v30 }
 0x4d3   :  { %v512_v32 = vmul.f32 1.442695, %v509_v31 }
 0x4d4   :  { %v575_v33 = vpop.permute.xlu0 %574 }
 0x4d5   :  { %1517 = vpow2.f32 %v512_v32  ;;  %v580_v34 = vsel %vm309_vm3, %v575_v33, 0 }
 0x4d6   :  { %1406 = vmatpush3.bf16.msra.mxu0 %v580_v34 }
 0x4d7   :  { %1417 = vmatprep.subr.bf16.mxu0 %v1655_v0 }
 0x4d8   :  { %v718_v5 = vpop.permute.xlu0 %717 }
 0x4de   :  { %v1516_v35 = vpop.eup %1515 }
 0x4df   :  { %v514_v36 = vsel %vm184_vm2, %v1516_v35, 0.0 }
 0x4e0   :  { %515 = vadd.xlane.f32.xlu1 %v514_v36 }
 0x4e2   :  { %v1518_v37 = vpop.eup %1517 }
 0x4e3   :  { %v517_v38 = vsel %vm184_vm2, %v1518_v37, 0.0 }
 0x4e4   :  { %518 = vadd.xlane.f32.xlu1 %v517_v38 }
 0x4f5   :  { %526 = vrot.lane.b32.xlu1 %v1729_v22, %s1662_s17 }
 0x4f9   :  { %719 = vrot.lane.b32.xlu1 %v1729_v22, %s1664_s19 }
 0x4fd   :  { %769 = vrot.lane.b32.xlu1 %v1732_v26, %s1664_s19 }
 0x501   :  { %767 = vrot.lane.b32.xlu1 %v1732_v26, %s1663_s18 }
 0x569   :  { %v516_v39 = vpop.xlane.xlu1 %515 }
 0x56a   :  { %1519 = vrcp.f32 %v516_v39 }
 0x56d   :  { %v519_v40 = vpop.xlane.xlu1 %518 }
 0x56e   :  { %1521 = vrcp.f32 %v519_v40 }
 0x571   :  { %v527_v41 = vpop.permute.xlu1 %526 }
 0x572   :  { %v532_v42 = vsel %vm309_vm3, %v527_v41, 0 }
 0x573   :  { %1400 = vmatpush3.bf16.msra.mxu1 %v532_v42 }
 0x574   :  { %1411 = vmatprep.subr.bf16.mxu1 %v1655_v0 }
 0x575   :  { %v720_v51 = vpop.permute.xlu1 %719 }
 0x576   :  { %v725_v1 = vsel %vm184_vm2, %v720_v51, 0 }
 0x577   :  { %v1520_v43 = vpop.eup %1519 }
 0x578   :  { %v522_v44 = vmul.f32 %v1520_v43, %v1516_v35 }
 0x579   :  { %v770_v52 = vpop.permute.xlu1 %769 }
 0x57a   :  { %v524_v45 = vpack.c.bf16 %v522_v44, %v522_v44  ;;  %v775_v53 = vsel %vm184_vm2, %v770_v52, 0 }
 0x57b   :  { %v1522_v46 = vpop.eup %1521 }
 0x57c   :  { %1402 = vmatmul.mubr.msk.bf16.vlgmr.msra.gmra.mxu1 %vm184_vm2, %v524_v45  ;;  %v523_v48 = vmul.f32 %v1522_v46, %v1518_v37 }
 0x57d   :  { %1413 = vmatprep.mubr.msk.bf16.mxu1 %vm1656_vm0, %v1655_v0  ;;  %v768_v54 = vpop.permute.xlu1 %767  ;;  %1412 = vmatpush3.bf16.msra.mxu1 %v627_v56 }
 0x57e   :  { %v525_v49 = vpack.c.bf16 %v523_v48, %v523_v48  ;;  %1423 = vmatprep.subr.bf16.mxu1 %v1655_v0 }
 0x580   :  { %1408 = vmatmul.mubr.msk.bf16.vlgmr.msra.gmra.mxu0 %vm184_vm2, %v525_v49 }
 0x581   :  { %1418 = vmatpush3.bf16.msra.mxu0 %v674_v50  ;;  %1419 = vmatprep.mubr.msk.bf16.mxu0 %vm1656_vm0, %v1655_v0  ;;  %v177_v50 = vld [vmem:[#allocation8 + $0x8] sm:$0xf] }
 0x582   :  { %1429 = vmatprep.subr.bf16.mxu0 %v1655_v0  ;;  %v942_v51 = vsel %vm309_vm3, %v177_v50, 0 }
 0x588   :  { %1420 = vmatmul.mubr.msk.bf16.vlgmr.msra.gmra.mxu0 %vm184_vm2, %v401_v10 }
 0x589   :  { %1430 = vmatpush3.bf16.xpose.msra.mxu0 %v775_v53  ;;  %1431 = vmatprep.mubr.msk.bf16.mxu0 %vm1656_vm0, %v1655_v0 }
 0x58a   :  { %1441 = vmatprep.subr.bf16.mxu0 %v1655_v0 }
 0x590   :  { %1432 = vmatmul.mubr.msk.bf16.vlgmr.msra.gmra.mxu0 %vm184_vm2, %v768_v54 }
 0x591   :  { %1443 = vmatprep.mubr.msk.bf16.mxu0 %vm1656_vm0, %v1655_v0 }
 0x63c   :  { %v568_v57 = vpop.f32.mrf.mxu1 }
 0x63e   :  { %v1403_v58 = vpop.f32.mrf.mxu1 }
 0x640   :  { %v571_v59 = vpop.f32.mrf.mxu1  ;;  %v616_v60 = vpop.f32.mrf.mxu0 }
 0x641   :  { %v622_v61 = vpack.c.bf16 %v616_v60, %v568_v57 }
 0x642   :  { %v1404_v62 = vpop.f32.mrf.mxu1  ;;  %v1409_v63 = vpop.f32.mrf.mxu0 }
 0x643   :  { %1414 = vmatmul.mubr.msk.bf16.vlgmr.msra.gmra.mxu1 %vm184_vm2, %v622_v61 }
 0x644   :  { %1424 = vmatpush3.bf16.xpose.msra.mxu1 %v725_v1  ;;  %v619_v2 = vpop.f32.mrf.mxu0  ;;  %1425 = vmatprep.mubr.msk.bf16.mxu1 %vm1656_vm0, %v1655_v0 }
 0x645   :  { %1435 = vmatprep.subr.bf16.mxu1 %v1655_v0 }
 0x646   :  { %v1410_v3 = vpop.f32.mrf.mxu0 }
 0x648   :  { %v1823_v4 = vpop.f32.mrf.mxu0 }
 0x64a   :  { %v1421_v6 = vpop.f32.mrf.mxu0 }
 0x64b   :  { %1426 = vmatmul.mubr.msk.bf16.vlgmr.msra.gmra.mxu1 %vm184_vm2, %v718_v5 }
 0x64c   :  { %v1826_v7 = vpop.f32.mrf.mxu0  ;;  %1437 = vmatprep.mubr.msk.bf16.mxu1 %vm1656_vm0, %v1655_v0 }
 0x64e   :  { %v1422_v8 = vpop.f32.mrf.mxu0 }
 0x650   :  { %v811_v9 = vpop.f32.mrf.mxu0 }
 0x651   :  { %v820_v10 = vsel %vm184_vm2, %v811_v9, -inf }
 0x652   :  { %821 = vmax.xlane.f32.xlu1 %v820_v10  ;;  %v1433_v11 = vpop.f32.mrf.mxu0 }
 0x654   :  { %v814_v12 = vpop.f32.mrf.mxu0 }
 0x656   :  { %v1434_v13 = vpop.f32.mrf.mxu0 }
 0x663   :  { %841 = vrot.lane.b32.xlu1 %v1729_v22, %s1652_s7 }
 0x667   :  { %989 = vrot.lane.b32.xlu1 %v1729_v22, %s1665_s20 }
 0x66b   :  { %1039 = vrot.lane.b32.xlu1 %v1732_v26, %s1665_s20 }
 0x66f   :  { %1037 = vrot.lane.b32.xlu1 %v1732_v26, %s1666_s21 }
 0x6db   :  { %v822_v14 = vpop.xlane.xlu1 %821 }
 0x6dc   :  { %v824_v17 = vsub.f32 %v811_v9, %v822_v14 }
 0x6de   :  { %v827_v18 = vmul.f32 1.442695, %v824_v17 }
 0x6df   :  { %v842_v15 = vpop.permute.xlu1 %841 }
 0x6e0   :  { %v847_v16 = vsel %vm309_vm3, %v842_v15, 0  ;;  %1523 = vpow2.f32 %v827_v18 }
 0x6e1   :  { %1436 = vmatpush3.bf16.msra.mxu1 %v847_v16 }
 0x6e2   :  { %1447 = vmatprep.subr.bf16.mxu1 %v1655_v0 }
 0x6e3   :  { %v990_v43 = vpop.permute.xlu1 %989 }
 0x6e4   :  { %v995_v45 = vsel %vm184_vm2, %v990_v43, 0 }
 0x6e7   :  { %v1040_v57 = vpop.permute.xlu1 %1039 }
 0x6e8   :  { %v1045_v1 = vsel %vm184_vm2, %v1040_v57, 0 }
 0x6eb   :  { %v1038_v6 = vpop.permute.xlu1 %1037 }
 0x6ed   :  { %v1524_v27 = vpop.eup %1523 }
 0x6ee   :  { %v832_v30 = vsel %vm184_vm2, %v1524_v27, 0.0 }
 0x703   :  { %v1839_v19 = vpop.f32.mrf.mxu1 }
 0x704   :  { %v711_v13 = vadd.f32 %v1823_v4, %v1839_v19 }
 0x705   :  { %v1415_v20 = vpop.f32.mrf.mxu1 }
 0x707   :  { %v1841_v21 = vpop.f32.mrf.mxu1 }
 0x708   :  { %v714_v17 = vadd.f32 %v1826_v7, %v1841_v21 }
 0x709   :  { %v1416_v23 = vpop.f32.mrf.mxu1 }
 0x70b   :  { %v761_v24 = vpop.f32.mrf.mxu1 }
 0x70c   :  { %v817_v25 = vsel %vm184_vm2, %v761_v24, -inf }
 0x70d   :  { %818 = vmax.xlane.f32.xlu0 %v817_v25  ;;  %v1427_v28 = vpop.f32.mrf.mxu1 }
 0x70f   :  { %v764_v29 = vpop.f32.mrf.mxu1 }
 0x711   :  { %v1428_v31 = vpop.f32.mrf.mxu1  ;;  %833 = vadd.xlane.f32.xlu0 %v832_v30 }
 0x796   :  { %v819_v32 = vpop.xlane.xlu0 %818 }
 0x797   :  { %v823_v33 = vsub.f32 %v761_v24, %v819_v32 }
 0x799   :  { %v825_v34 = vmul.f32 1.442695, %v823_v33 }
 0x79a   :  { %v834_v37 = vpop.xlane.xlu0 %833 }
 0x79b   :  { %1525 = vpow2.f32 %v825_v34 }
 0x79c   :  { %1527 = vrcp.f32 %v834_v37 }
 0x7a8   :  { %v1526_v35 = vpop.eup %1525 }
 0x7a9   :  { %v829_v36 = vsel %vm184_vm2, %v1526_v35, 0.0  ;;  %v1528_v38 = vpop.eup %1527 }
 0x7aa   :  { %830 = vadd.xlane.f32.xlu0 %v829_v36  ;;  %v838_v40 = vmul.f32 %v1528_v38, %v1524_v27  ;;  %v178_v36 = vld [vmem:[#allocation8 + $0xc] sm:$0xf] }
 0x7ab   :  { %v1212_v37 = vsel %vm309_vm3, %v178_v36, 0 }
 0x7ac   :  { %v840_v44 = vpack.c.bf16 %v838_v40, %v838_v40 }
 0x7c0   :  { %889 = vrot.lane.b32.xlu0 %v1732_v26, %s1652_s7 }
 0x7c4   :  { %987 = vrot.lane.b32.xlu0 %v1729_v22, %s1666_s21 }
 0x833   :  { %v831_v39 = vpop.xlane.xlu0 %830 }
 0x834   :  { %1529 = vrcp.f32 %v831_v39 }
 0x837   :  { %v890_v41 = vpop.permute.xlu0 %889 }
 0x838   :  { %v895_v42 = vsel %vm309_vm3, %v890_v41, 0 }
 0x839   :  { %1442 = vmatpush3.bf16.msra.mxu0 %v895_v42 }
 0x83a   :  { %1453 = vmatprep.subr.bf16.mxu0 %v1655_v0 }
 0x83b   :  { %v988_v48 = vpop.permute.xlu0 %987 }
 0x83c   :  { %1444 = vmatmul.mubr.msk.bf16.vlgmr.msra.gmra.mxu0 %vm184_vm2, %v840_v44 }
 0x83d   :  { %1454 = vmatpush3.bf16.xpose.msra.mxu0 %v995_v45  ;;  %1455 = vmatprep.mubr.msk.bf16.mxu0 %vm1656_vm0, %v1655_v0 }
 0x83e   :  { %1465 = vmatprep.subr.bf16.mxu0 %v1655_v0 }
 0x841   :  { %v1530_v46 = vpop.eup %1529 }
 0x842   :  { %v837_v47 = vmul.f32 %v1530_v46, %v1526_v35 }
 0x844   :  { %1456 = vmatmul.mubr.msk.bf16.vlgmr.msra.gmra.mxu0 %vm184_vm2, %v988_v48  ;;  %v839_v49 = vpack.c.bf16 %v837_v47, %v837_v47 }
 0x845   :  { %1467 = vmatprep.mubr.msk.bf16.mxu0 %vm1656_vm0, %v1655_v0 }
 0x846   :  { %1438 = vmatmul.mubr.msk.bf16.vlgmr.msra.gmra.mxu1 %vm184_vm2, %v839_v49 }
 0x847   :  { %1449 = vmatprep.mubr.msk.bf16.mxu1 %vm1656_vm0, %v1655_v0  ;;  %1448 = vmatpush3.bf16.msra.mxu1 %v942_v51 }
 0x848   :  { %1459 = vmatprep.subr.bf16.mxu1 %v1655_v0 }
 0x8fc   :  { %v931_v52 = vpop.f32.mrf.mxu0 }
 0x8fe   :  { %v1445_v53 = vpop.f32.mrf.mxu0 }
 0x900   :  { %v934_v54 = vpop.f32.mrf.mxu0 }
 0x902   :  { %v1446_v55 = vpop.f32.mrf.mxu0 }
 0x904   :  { %v1031_v56 = vpop.f32.mrf.mxu0 }
 0x905   :  { %v1087_v58 = vsel %vm184_vm2, %v1031_v56, -inf }
 0x906   :  { %v883_v59 = vpop.f32.mrf.mxu1  ;;  %1088 = vmax.xlane.f32.xlu0 %v1087_v58  ;;  %v1457_v60 = vpop.f32.mrf.mxu0 }
 0x907   :  { %v937_v61 = vpack.c.bf16 %v931_v52, %v883_v59  ;;  %v1311_v52 = vld [vmem:[%s1907_s4] ss:$0 sm:$0xff] }
 0x908   :  { %v1439_v62 = vpop.f32.mrf.mxu1  ;;  %v1034_v63 = vpop.f32.mrf.mxu0 }
 0x909   :  { %1450 = vmatmul.mubr.msk.bf16.vlgmr.msra.gmra.mxu1 %vm184_vm2, %v937_v61 }
 0x90a   :  { %1460 = vmatpush3.bf16.xpose.msra.mxu1 %v1045_v1  ;;  %v886_v2 = vpop.f32.mrf.mxu1  ;;  %v1458_v3 = vpop.f32.mrf.mxu0  ;;  %1461 = vmatprep.mubr.msk.bf16.mxu1 %vm1656_vm0, %v1655_v0 }
 0x90b   :  { %1471 = vmatprep.subr.bf16.mxu1 %v1655_v0 }
 0x90c   :  { %v1440_v5 = vpop.f32.mrf.mxu1 }
 0x911   :  { %1462 = vmatmul.mubr.msk.bf16.vlgmr.msra.gmra.mxu1 %vm184_vm2, %v1038_v6 }
 0x912   :  { %1473 = vmatprep.mubr.msk.bf16.mxu1 %vm1656_vm0, %v1655_v0 }
 0x98f   :  { %v1089_v8 = vpop.xlane.xlu0 %1088 }
 0x990   :  { %v1093_v9 = vsub.f32 %v1031_v56, %v1089_v8 }
 0x992   :  { %v1095_v10 = vmul.f32 1.442695, %v1093_v9 }
 0x994   :  { %1531 = vpow2.f32 %v1095_v10 }
 0x9a1   :  { %v1532_v11 = vpop.eup %1531 }
 0x9a2   :  { %v1099_v12 = vsel %vm184_vm2, %v1532_v11, 0.0 }
 0x9a3   :  { %1100 = vadd.xlane.f32.xlu0 %v1099_v12 }
 0x9c9   :  { %v978_v14 = vpop.f32.mrf.mxu1 }
 0x9ca   :  { %v985_v15 = vadd.f32 %v978_v14, %v711_v13 }
 0x9cb   :  { %v1451_v16 = vpop.f32.mrf.mxu1 }
 0x9cd   :  { %v981_v18 = vpop.f32.mrf.mxu1 }
 0x9ce   :  { %v986_v20 = vadd.f32 %v981_v18, %v714_v17 }
 0x9cf   :  { %v1452_v23 = vpop.f32.mrf.mxu1 }
 0x9d1   :  { %v1081_v24 = vpop.f32.mrf.mxu1 }
 0x9d2   :  { %v1090_v25 = vsel %vm184_vm2, %v1081_v24, -inf }
 0x9d3   :  { %1091 = vmax.xlane.f32.xlu1 %v1090_v25  ;;  %v1463_v27 = vpop.f32.mrf.mxu1 }
 0x9d5   :  { %v1084_v28 = vpop.f32.mrf.mxu1 }
 0x9d7   :  { %v1464_v29 = vpop.f32.mrf.mxu1 }
 0x9e4   :  { %1111 = vrot.lane.b32.xlu1 %v1729_v22, %s1667_s22 }
 0xa2c   :  { %v1101_v4 = vpop.xlane.xlu0 %1100 }
 0xa2d   :  { %1533 = vrcp.f32 %v1101_v4 }
 0xa3a   :  { %v1534_v19 = vpop.eup %1533 }
 0xa3b   :  { %v1107_v7 = vmul.f32 %v1534_v19, %v1532_v11 }
 0xa3d   :  { %v1109_v34 = vpack.c.bf16 %v1107_v7, %v1107_v7 }
 0xa5c   :  { %v1092_v30 = vpop.xlane.xlu1 %1091 }
 0xa5d   :  { %v1094_v31 = vsub.f32 %v1081_v24, %v1092_v30 }
 0xa5f   :  { %v1097_v32 = vmul.f32 1.442695, %v1094_v31 }
 0xa60   :  { %v1112_v21 = vpop.permute.xlu1 %1111 }
 0xa61   :  { %1535 = vpow2.f32 %v1097_v32  ;;  %v1117_v33 = vsel %vm309_vm3, %v1112_v21, 0 }
 0xa62   :  { %1466 = vmatpush3.bf16.msra.mxu0 %v1117_v33 }
 0xa63   :  { %1477 = vmatprep.subr.bf16.mxu0 %v1655_v0 }
 0xa65   :  { %1468 = vmatmul.mubr.msk.bf16.vlgmr.msra.gmra.mxu0 %vm184_vm2, %v1109_v34 }
 0xa66   :  { %1479 = vmatprep.mubr.msk.bf16.mxu0 %vm1656_vm0, %v1655_v0  ;;  %1478 = vmatpush3.bf16.msra.mxu0 %v1212_v37 }
 0xa6e   :  { %v1536_v22 = vpop.eup %1535 }
 0xa6f   :  { %v1102_v35 = vsel %vm184_vm2, %v1536_v22, 0.0 }
 0xa70   :  { %1103 = vadd.xlane.f32.xlu0 %v1102_v35 }
 0xa86   :  { %1159 = vrot.lane.b32.xlu0 %v1732_v26, %s1667_s22 }
 0xaf9   :  { %v1104_v38 = vpop.xlane.xlu0 %1103 }
 0xafa   :  { %1537 = vrcp.f32 %v1104_v38 }
 0xafd   :  { %v1160_v39 = vpop.permute.xlu0 %1159 }
 0xafe   :  { %v1165_v40 = vsel %vm309_vm3, %v1160_v39, 0 }
 0xaff   :  { %1472 = vmatpush3.bf16.msra.mxu1 %v1165_v40 }
 0xb07   :  { %v1538_v41 = vpop.eup %1537 }
 0xb08   :  { %v1108_v42 = vmul.f32 %v1538_v41, %v1536_v22 }
 0xb0a   :  { %v1110_v43 = vpack.c.bf16 %v1108_v42, %v1108_v42 }
 0xb0c   :  { %1474 = vmatmul.mubr.msk.bf16.vlgmr.msra.gmra.mxu1 %vm184_vm2, %v1110_v43 }
 0xb25   :  { %v1153_v0 = vpop.f32.mrf.mxu0 }
 0xb27   :  { %v1469_v44 = vpop.f32.mrf.mxu0 }
 0xb29   :  { %v1156_v45 = vpop.f32.mrf.mxu0 }
 0xb2b   :  { %v1470_v46 = vpop.f32.mrf.mxu0 }
 0xbcc   :  { %v1201_v26 = vpop.f32.mrf.mxu1 }
 0xbcd   :  { %v1207_v47 = vpack.c.bf16 %v1201_v26, %v1153_v0 }
 0xbce   :  { %v1475_v48 = vpop.f32.mrf.mxu1 }
 0xbcf   :  { %1480 = vmatmul.mubr.msk.bf16.vlgmr.msra.gmra.mxu0 %vm184_vm2, %v1207_v47 }
 0xbd0   :  { %v1204_v49 = vpop.f32.mrf.mxu1 }
 0xbd2   :  { %v1476_v50 = vpop.f32.mrf.mxu1 }
 0xc8f   :  { %v1248_v51 = vpop.f32.mrf.mxu0 }
 0xc90   :  { %v1255_v53 = vadd.f32 %v1248_v51, %v985_v15 }
 0xc91   :  { %v1481_v54 = vpop.f32.mrf.mxu0 }
 0xc92   :  { %v1264_v55 = vadd.f32 %v1311_v52, %v1255_v53 }
 0xc93   :  { %v1251_v56 = vpop.f32.mrf.mxu0 }
 0xc94   :  { %1266 = vst.msk [vmem:[#allocation10] sm:$0xff] %vm94_vm1, %v1264_v55  ;;  %v1256_v57 = vadd.f32 %v1251_v56, %v986_v20 }
 0xc95   :  { %v1482_v58 = vpop.f32.mrf.mxu0 }
 0xc96   :  { %v1265_v59 = vadd.f32 %v1311_v52, %v1256_v57 }
 0xc98   :  { %1267 = vst.msk [vmem:[#allocation10 + $0x8] sm:$0xff] %vm94_vm1, %v1265_v59 }
 0xc99   :  { %1630 = shalt.err (!%p1627_p10)
}
 0xc9a   :  { %1279 = dma.vmem_to_hbm [thread:$0]  %s1274_s28, 256, %s1908_s5, [#allocation4], %s1649_s26, %s1649_s26, %s1650_s27  }
 0xc9b   :  { %1645 = dma.done.wait [#allocation4], 256  }
 0xc9c   :  { %1646 = vsyncadd [#allocation4], 4294967040 }
 0xc9d   :  { %1283 = vsyncpa [#allocation3], 1 }
 0xc9e   :  { %1284 = vsyncpa [#allocation6], 1 }
 0xc9f   :  { %1285 = vsyncpa [#allocation9], 1 }
 0xca0   :  { %1286 = vsyncpa [#allocation4], 1 }

</bundles_post_ra>
